<compile_context>
chip_gen: v7x
topology: tpu7x:2x2x1
jax: 0.10.0
libtpu: 0.0.40
codegen_flags: <defaults>
</compile_context>

<pallas_src>
import functools

import jax
import jax.numpy as jnp
from jax.experimental import pallas as pl
from jax.experimental.pallas import tpu as pltpu


# ---------------------------------------------------------------------------
# Shared helpers
# ---------------------------------------------------------------------------
def _layer_norm(y, gamma, beta, eps):
    """LayerNorm over the last dim (biased variance), f32 math."""
    mean = jnp.mean(y, axis=-1, keepdims=True)
    centered = y - mean
    var = jnp.mean(centered * centered, axis=-1, keepdims=True)
    return centered * jax.lax.rsqrt(var + eps) * gamma + beta


# ---------------------------------------------------------------------------
# Fused EncoderLayer kernel: one grid step = one (batch, head)
# ---------------------------------------------------------------------------
def _encoder_layer_kernel(
    x_ref, wq_ref, wk_ref, wv_ref, wfc_ref,
    ln1_g_ref, ln1_b_ref,
    w1_ref, b1_ref, w2_ref, b2_ref,
    ln2_g_ref, ln2_b_ref,
    out_ref, attn_ref,
    acc_ref,
    *, scale, eps,
):
    h = pl.program_id(1)

    @pl.when(h == 0)
    def _():
        acc_ref[...] = jnp.zeros_like(acc_ref)

    x_f32 = x_ref[...]                                   # (L, d_model) f32
    x_bf = x_f32.astype(jnp.bfloat16)

    # per-head q/k/v projections (bf16 MXU operands, f32 accumulation)
    q = jnp.dot(x_bf, wq_ref[...], preferred_element_type=jnp.float32)  # (L, d_k)
    k = jnp.dot(x_bf, wk_ref[...], preferred_element_type=jnp.float32)  # (L, d_k)
    v = jnp.dot(x_bf, wv_ref[...], preferred_element_type=jnp.float32)  # (L, d_v)

    # scores = (q / temperature) @ k^T  via dot_general (no explicit transpose)
    scores = jax.lax.dot_general(
        (q * scale).astype(jnp.bfloat16),
        k.astype(jnp.bfloat16),
        (((1,), (1,)), ((), ())),
        preferred_element_type=jnp.float32,
    )                                                    # (L, L)

    # softmax over the last dim (f32)
    m = jnp.max(scores, axis=-1, keepdims=True)
    p = jnp.exp(scores - m)
    denom = jnp.sum(p, axis=-1, keepdims=True)
    attn = p * pl.reciprocal(denom, approx=True)
    attn_ref[...] = attn.astype(attn_ref.dtype)

    out_h = jnp.dot(attn.astype(jnp.bfloat16), v.astype(jnp.bfloat16),
                    preferred_element_type=jnp.float32)  # (L, d_v)

    # accumulate this head's contribution to the output projection (fc)
    acc_ref[...] += jnp.dot(out_h.astype(jnp.bfloat16), wfc_ref[...],
                            preferred_element_type=jnp.float32)  # (L, d_model)

    @pl.when(h == pl.num_programs(1) - 1)
    def _():
        # ---- MHA epilogue: residual + LayerNorm1 ----
        y = _layer_norm(acc_ref[...] + x_f32, ln1_g_ref[...], ln1_b_ref[...], eps)
        # ---- Position-wise FFN: relu(y @ W1 + b1) @ W2 + b2 ----
        h1 = jnp.dot(y.astype(jnp.bfloat16), w1_ref[...],
                     preferred_element_type=jnp.float32) + b1_ref[...]
        h1 = jnp.maximum(h1, 0.0)
        y2 = jnp.dot(h1.astype(jnp.bfloat16), w2_ref[...],
                     preferred_element_type=jnp.float32) + b2_ref[...]
        # ---- residual + LayerNorm2 ----
        y2 = _layer_norm(y2 + y, ln2_g_ref[...], ln2_b_ref[...], eps)
        out_ref[...] = y2.astype(out_ref.dtype)


def encoder_layer_forward(x, prepared, n_head, d_k, d_v, d_inner):
    """x: (B, L, d_model) f32 -> (enc_output (B,L,d_model), attn (B,H,L,L))."""
    B, L, d_model = x.shape
    scale = 1.0 / (float(d_k) ** 0.5)
    kernel = functools.partial(_encoder_layer_kernel, scale=scale, eps=1e-6)

    in_specs = [
        pl.BlockSpec((None, L, d_model), lambda b, h: (b, 0, 0)),      # x
        pl.BlockSpec((None, d_model, d_k), lambda b, h: (h, 0, 0)),    # wq  (H,dm,dk)
        pl.BlockSpec((None, d_model, d_k), lambda b, h: (h, 0, 0)),    # wk
        pl.BlockSpec((None, d_model, d_v), lambda b, h: (h, 0, 0)),    # wv
        pl.BlockSpec((None, d_v, d_model), lambda b, h: (h, 0, 0)),    # wfc (H,dv,dm)
        pl.BlockSpec((1, d_model), lambda b, h: (0, 0)),               # ln1 gamma
        pl.BlockSpec((1, d_model), lambda b, h: (0, 0)),               # ln1 beta
        pl.BlockSpec((d_model, d_inner), lambda b, h: (0, 0)),         # w1_t
        pl.BlockSpec((1, d_inner), lambda b, h: (0, 0)),               # b1
        pl.BlockSpec((d_inner, d_model), lambda b, h: (0, 0)),         # w2_t
        pl.BlockSpec((1, d_model), lambda b, h: (0, 0)),               # b2
        pl.BlockSpec((1, d_model), lambda b, h: (0, 0)),               # ln2 gamma
        pl.BlockSpec((1, d_model), lambda b, h: (0, 0)),               # ln2 beta
    ]
    out_specs = (
        pl.BlockSpec((None, L, d_model), lambda b, h: (b, 0, 0)),      # enc_output
        pl.BlockSpec((None, None, L, L), lambda b, h: (b, h, 0, 0)),   # attn
    )

    return pl.pallas_call(
        kernel,
        out_shape=(
            jax.ShapeDtypeStruct((B, L, d_model), jnp.float32),
            jax.ShapeDtypeStruct((B, n_head, L, L), jnp.float32),
        ),
        grid=(B, n_head),
        in_specs=in_specs,
        out_specs=out_specs,
        scratch_shapes=[pltpu.VMEM((L, d_model), jnp.float32)],
        compiler_params=pltpu.CompilerParams(
            dimension_semantics=("parallel", "arbitrary"),
        ),
    )(
        x,
        prepared["wq"], prepared["wk"], prepared["wv"], prepared["wfc"],
        prepared["ln1_g"], prepared["ln1_b"],
        prepared["w1_t"], prepared["b1"], prepared["w2_t"], prepared["b2"],
        prepared["ln2_g"], prepared["ln2_b"],
    )


# ---------------------------------------------------------------------------
# Parameters (PyTorch layout) + one-time kernel-friendly re-layout
# ---------------------------------------------------------------------------
def init_params(key, n_head, d_model, d_inner, d_k, d_v):
    ks = jax.random.split(key, 8)
    s = 0.05
    return {
        # PyTorch Linear weight layout: (out_features, in_features)
        "w_qs": s * jax.random.normal(ks[0], (n_head * d_k, d_model), jnp.float32),
        "w_ks": s * jax.random.normal(ks[1], (n_head * d_k, d_model), jnp.float32),
        "w_vs": s * jax.random.normal(ks[2], (n_head * d_v, d_model), jnp.float32),
        "w_fc": s * jax.random.normal(ks[3], (d_model, n_head * d_v), jnp.float32),
        "ln1_gamma": jnp.ones((d_model,), jnp.float32),
        "ln1_beta": jnp.zeros((d_model,), jnp.float32),
        "w_1": s * jax.random.normal(ks[4], (d_inner, d_model), jnp.float32),
        "b_1": s * jax.random.normal(ks[5], (d_inner,), jnp.float32),
        "w_2": s * jax.random.normal(ks[6], (d_model, d_inner), jnp.float32),
        "b_2": s * jax.random.normal(ks[7], (d_model,), jnp.float32),
        "ln2_gamma": jnp.ones((d_model,), jnp.float32),
        "ln2_beta": jnp.zeros((d_model,), jnp.float32),
    }


def prepare_params(params, n_head, d_k, d_v):
    """One-time re-layout: per-head weights, pre-transposed, bf16 MXU operands."""
    d_model = params["w_qs"].shape[1]
    d_inner = params["w_1"].shape[0]

    def split_heads(w, d):  # (H*d, d_in) -> (H, d_in, d)
        return jnp.transpose(w.reshape(n_head, d, -1), (0, 2, 1))

    return {
        "wq": split_heads(params["w_qs"], d_k).astype(jnp.bfloat16),
        "wk": split_heads(params["w_ks"], d_k).astype(jnp.bfloat16),
        "wv": split_heads(params["w_vs"], d_v).astype(jnp.bfloat16),
        # fc: (d_model, H*d_v) -> (H, d_v, d_model)
        "wfc": params["w_fc"].T.reshape(n_head, d_v, d_model).astype(jnp.bfloat16),
        "ln1_g": params["ln1_gamma"].reshape(1, d_model),
        "ln1_b": params["ln1_beta"].reshape(1, d_model),
        "w1_t": params["w_1"].T.astype(jnp.bfloat16),      # (d_model, d_inner)
        "b1": params["b_1"].reshape(1, d_inner),
        "w2_t": params["w_2"].T.astype(jnp.bfloat16),      # (d_inner, d_model)
        "b2": params["b_2"].reshape(1, d_model),
        "ln2_g": params["ln2_gamma"].reshape(1, d_model),
        "ln2_b": params["ln2_beta"].reshape(1, d_model),
    }


# ---------------------------------------------------------------------------
# Pure-JAX reference (mirrors the PyTorch module, f32 everywhere)
# ---------------------------------------------------------------------------
def encoder_layer_reference(x, params, n_head, d_k, d_v, eps=1e-6):
    B, L, d_model = x.shape
    residual = x
    q = (x @ params["w_qs"].T).reshape(B, L, n_head, d_k).transpose(0, 2, 1, 3)
    k = (x @ params["w_ks"].T).reshape(B, L, n_head, d_k).transpose(0, 2, 1, 3)
    v = (x @ params["w_vs"].T).reshape(B, L, n_head, d_v).transpose(0, 2, 1, 3)
    scores = (q / (float(d_k) ** 0.5)) @ jnp.swapaxes(k, -1, -2)
    attn = jax.nn.softmax(scores, axis=-1)
    out = (attn @ v).transpose(0, 2, 1, 3).reshape(B, L, n_head * d_v)
    y = _layer_norm(out @ params["w_fc"].T + residual,
                    params["ln1_gamma"], params["ln1_beta"], eps)
    h1 = jax.nn.relu(y @ params["w_1"].T + params["b_1"])
    y2 = _layer_norm(h1 @ params["w_2"].T + params["b_2"] + y,
                     params["ln2_gamma"], params["ln2_beta"], eps)
    return y2, attn


# ---------------------------------------------------------------------------
# Demo / self-check
# ---------------------------------------------------------------------------
if __name__ == "__main__":
    B, L = 2, 8
    n_head, d_model, d_inner, d_k, d_v = 2, 32, 64, 16, 16

    key = jax.random.PRNGKey(0)
    kx, kp = jax.random.split(key)
    x = jax.random.normal(kx, (B, L, d_model), jnp.float32)
    params = init_params(kp, n_head, d_model, d_inner, d_k, d_v)
    prepared = prepare_params(params, n_head, d_k, d_v)

    enc_out, attn = encoder_layer_forward(x, prepared, n_head, d_k, d_v, d_inner)
    jax.block_until_ready((enc_out, attn))

    assert enc_out.shape == (B, L, d_model)
    assert attn.shape == (B, n_head, L, L)

    # correctness vs pure-JAX reference (loose tolerance: bf16 MXU operands)
    out_ref, attn_ref = encoder_layer_reference(x, params, n_head, d_k, d_v)
    assert jnp.allclose(attn, attn_ref, atol=5e-2, rtol=5e-2), float(
        jnp.max(jnp.abs(attn - attn_ref)))
    assert jnp.allclose(enc_out, out_ref, atol=5e-2, rtol=5e-2), float(
        jnp.max(jnp.abs(enc_out - out_ref)))

    print("KERNEL_OK")
</pallas_src>

<mosaic_0001>
module attributes {stable_mosaic.version = 11 : i64} {
  func.func @_encoder_layer_kernel(%arg0: i32, %arg1: i32, %arg2: memref<1x8x32xf32, #tpu.memory_space<vmem>>, %arg3: memref<1x32x16xbf16, #tpu.memory_space<vmem>>, %arg4: memref<1x32x16xbf16, #tpu.memory_space<vmem>>, %arg5: memref<1x32x16xbf16, #tpu.memory_space<vmem>>, %arg6: memref<1x16x32xbf16, #tpu.memory_space<vmem>>, %arg7: memref<1x32xf32, #tpu.memory_space<vmem>>, %arg8: memref<1x32xf32, #tpu.memory_space<vmem>>, %arg9: memref<32x64xbf16, #tpu.memory_space<vmem>>, %arg10: memref<1x64xf32, #tpu.memory_space<vmem>>, %arg11: memref<64x32xbf16, #tpu.memory_space<vmem>>, %arg12: memref<1x32xf32, #tpu.memory_space<vmem>>, %arg13: memref<1x32xf32, #tpu.memory_space<vmem>>, %arg14: memref<1x32xf32, #tpu.memory_space<vmem>>, %arg15: memref<1x8x32xf32, #tpu.memory_space<vmem>>, %arg16: memref<1x1x8x8xf32, #tpu.memory_space<vmem>>, %arg17: memref<8x32xf32, #tpu.memory_space<vmem>>) attributes {dimension_semantics = [#tpu.dimension_semantics<parallel>, #tpu.dimension_semantics<arbitrary>], iteration_bounds = array<i64: 2, 2>, scalar_prefetch = 0 : i64, scratch_operands = 1 : i64, tpu.core_type = #tpu.core_type<tc>, window_params = [{transform_indices = @transform_0, window_bounds = array<i64: 1, 8, 32>}, {transform_indices = @transform_1, window_bounds = array<i64: 1, 32, 16>}, {transform_indices = @transform_2, window_bounds = array<i64: 1, 32, 16>}, {transform_indices = @transform_3, window_bounds = array<i64: 1, 32, 16>}, {transform_indices = @transform_4, window_bounds = array<i64: 1, 16, 32>}, {pipeline_mode = #tpu.pipeline_mode<synchronous>, transform_indices = @transform_5, window_bounds = array<i64: 1, 32>}, {pipeline_mode = #tpu.pipeline_mode<synchronous>, transform_indices = @transform_6, window_bounds = array<i64: 1, 32>}, {pipeline_mode = #tpu.pipeline_mode<synchronous>, transform_indices = @transform_7, window_bounds = array<i64: 32, 64>}, {pipeline_mode = #tpu.pipeline_mode<synchronous>, transform_indices = @transform_8, window_bounds = array<i64: 1, 64>}, {pipeline_mode = #tpu.pipeline_mode<synchronous>, transform_indices = @transform_9, window_bounds = array<i64: 64, 32>}, {pipeline_mode = #tpu.pipeline_mode<synchronous>, transform_indices = @transform_10, window_bounds = array<i64: 1, 32>}, {pipeline_mode = #tpu.pipeline_mode<synchronous>, transform_indices = @transform_11, window_bounds = array<i64: 1, 32>}, {pipeline_mode = #tpu.pipeline_mode<synchronous>, transform_indices = @transform_12, window_bounds = array<i64: 1, 32>}, {transform_indices = @transform_13, window_bounds = array<i64: 1, 8, 32>}, {transform_indices = @transform_14, window_bounds = array<i64: 1, 1, 8, 8>}]} {
    %c0_i32 = arith.constant 0 : i32
    %0 = arith.cmpi eq, %arg1, %c0_i32 : i32
    %1 = arith.extui %0 : i1 to i32
    %c0_i32_0 = arith.constant 0 : i32
    %2 = arith.cmpi ne, %1, %c0_i32_0 : i32
    scf.if %2 {
      %cst_32 = arith.constant 0.000000e+00 : f32
      %46 = vector.broadcast %cst_32 : f32 to vector<8x32xf32>
      %c0_33 = arith.constant 0 : index
      %c0_34 = arith.constant 0 : index
      %47 = vector.load %arg17[%c0_33, %c0_34] : memref<8x32xf32, #tpu.memory_space<vmem>>, vector<8x32xf32>
      tpu.vector_store %arg17[%c0_33, %c0_34], %46 {strides = array<i32>} : memref<8x32xf32, #tpu.memory_space<vmem>>, vector<8x32xf32>,
    } else {
    }
    %c0 = arith.constant 0 : index
    %c0_1 = arith.constant 0 : index
    %c0_2 = arith.constant 0 : index
    %3 = vector.load %arg2[%c0, %c0_1, %c0_2] : memref<1x8x32xf32, #tpu.memory_space<vmem>>, vector<1x8x32xf32>
    %4 = vector.shape_cast %3 : vector<1x8x32xf32> to vector<8x32xf32>
    %5 = arith.truncf %4 : vector<8x32xf32> to vector<8x32xbf16>
    %c0_3 = arith.constant 0 : index
    %c0_4 = arith.constant 0 : index
    %c0_5 = arith.constant 0 : index
    %6 = vector.load %arg3[%c0_3, %c0_4, %c0_5] : memref<1x32x16xbf16, #tpu.memory_space<vmem>>, vector<1x32x16xbf16>
    %7 = vector.shape_cast %6 : vector<1x32x16xbf16> to vector<32x16xbf16>
    %cst = arith.constant dense<0.000000e+00> : vector<8x16xf32>
    %8 = tpu.matmul %5, %7, %cst {dimension_numbers = #tpu.dot_dimension_numbers<[1], [0], [0], [1], [0, 0, 1, 1], [], []>} : vector<8x32xbf16>, vector<32x16xbf16>, vector<8x16xf32> -> vector<8x16xf32>
    %c0_6 = arith.constant 0 : index
    %c0_7 = arith.constant 0 : index
    %c0_8 = arith.constant 0 : index
    %9 = vector.load %arg4[%c0_6, %c0_7, %c0_8] : memref<1x32x16xbf16, #tpu.memory_space<vmem>>, vector<1x32x16xbf16>
    %10 = vector.shape_cast %9 : vector<1x32x16xbf16> to vector<32x16xbf16>
    %cst_9 = arith.constant dense<0.000000e+00> : vector<8x16xf32>
    %11 = tpu.matmul %5, %10, %cst_9 {dimension_numbers = #tpu.dot_dimension_numbers<[1], [0], [0], [1], [0, 0, 1, 1], [], []>} : vector<8x32xbf16>, vector<32x16xbf16>, vector<8x16xf32> -> vector<8x16xf32>
    %c0_10 = arith.constant 0 : index
    %c0_11 = arith.constant 0 : index
    %c0_12 = arith.constant 0 : index
    %12 = vector.load %arg5[%c0_10, %c0_11, %c0_12] : memref<1x32x16xbf16, #tpu.memory_space<vmem>>, vector<1x32x16xbf16>
    %13 = vector.shape_cast %12 : vector<1x32x16xbf16> to vector<32x16xbf16>
    %cst_13 = arith.constant dense<0.000000e+00> : vector<8x16xf32>
    %14 = tpu.matmul %5, %13, %cst_13 {dimension_numbers = #tpu.dot_dimension_numbers<[1], [0], [0], [1], [0, 0, 1, 1], [], []>} : vector<8x32xbf16>, vector<32x16xbf16>, vector<8x16xf32> -> vector<8x16xf32>
    %cst_14 = arith.constant 2.500000e-01 : f32
    %15 = vector.broadcast %cst_14 : f32 to vector<8x16xf32>
    %16 = arith.mulf %8, %15 : vector<8x16xf32>
    %17 = arith.truncf %16 : vector<8x16xf32> to vector<8x16xbf16>
    %18 = arith.truncf %11 : vector<8x16xf32> to vector<8x16xbf16>
    %cst_15 = arith.constant dense<0.000000e+00> : vector<8x8xf32>
    %19 = tpu.matmul %17, %18, %cst_15 {dimension_numbers = #tpu.dot_dimension_numbers<[1], [1], [0], [0], [0, 0, 1, 0], [], []>} : vector<8x16xbf16>, vector<8x16xbf16>, vector<8x8xf32> -> vector<8x8xf32>
    %cst_16 = arith.constant dense<0xFF800000> : vector<8xf32>
    %20 = vector.multi_reduction <maximumf>, %19, %cst_16 [1] : vector<8x8xf32> to vector<8xf32>
    %21 = vector.shape_cast %20 : vector<8xf32> to vector<8x1xf32>
    %22 = vector.broadcast %21 : vector<8x1xf32> to vector<8x8xf32>
    %23 = arith.subf %19, %22 : vector<8x8xf32>
    %24 = math.exp %23 : vector<8x8xf32>
    %cst_17 = arith.constant dense<0.000000e+00> : vector<8xf32>
    %25 = vector.multi_reduction <add>, %24, %cst_17 [1] : vector<8x8xf32> to vector<8xf32>
    %26 = vector.shape_cast %25 : vector<8xf32> to vector<8x1xf32>
    %27 = tpu.reciprocal %26 {approx = true} : vector<8x1xf32> -> vector<8x1xf32>
    %28 = vector.broadcast %27 : vector<8x1xf32> to vector<8x8xf32>
    %29 = arith.mulf %24, %28 : vector<8x8xf32>
    %c0_18 = arith.constant 0 : index
    %c0_19 = arith.constant 0 : index
    %c0_20 = arith.constant 0 : index
    %c0_21 = arith.constant 0 : index
    %30 = vector.load %arg16[%c0_18, %c0_19, %c0_20, %c0_21] : memref<1x1x8x8xf32, #tpu.memory_space<vmem>>, vector<1x1x8x8xf32>
    %31 = vector.shape_cast %30 : vector<1x1x8x8xf32> to vector<8x8xf32>
    %32 = vector.shape_cast %29 : vector<8x8xf32> to vector<1x1x8x8xf32>
    tpu.vector_store %arg16[%c0_18, %c0_19, %c0_20, %c0_21], %32 {strides = array<i32>} : memref<1x1x8x8xf32, #tpu.memory_space<vmem>>, vector<1x1x8x8xf32>,
    %33 = arith.truncf %29 : vector<8x8xf32> to vector<8x8xbf16>
    %34 = arith.truncf %14 : vector<8x16xf32> to vector<8x16xbf16>
    %cst_22 = arith.constant dense<0.000000e+00> : vector<8x16xf32>
    %35 = tpu.matmul %33, %34, %cst_22 {dimension_numbers = #tpu.dot_dimension_numbers<[1], [0], [0], [1], [0, 0, 1, 1], [], []>} : vector<8x8xbf16>, vector<8x16xbf16>, vector<8x16xf32> -> vector<8x16xf32>
    %c0_23 = arith.constant 0 : index
    %c0_24 = arith.constant 0 : index
    %36 = vector.load %arg17[%c0_23, %c0_24] : memref<8x32xf32, #tpu.memory_space<vmem>>, vector<8x32xf32>
    %37 = arith.truncf %35 : vector<8x16xf32> to vector<8x16xbf16>
    %c0_25 = arith.constant 0 : index
    %c0_26 = arith.constant 0 : index
    %c0_27 = arith.constant 0 : index
    %38 = vector.load %arg6[%c0_25, %c0_26, %c0_27] : memref<1x16x32xbf16, #tpu.memory_space<vmem>>, vector<1x16x32xbf16>
    %39 = vector.shape_cast %38 : vector<1x16x32xbf16> to vector<16x32xbf16>
    %cst_28 = arith.constant dense<0.000000e+00> : vector<8x32xf32>
    %40 = tpu.matmul %37, %39, %cst_28 {dimension_numbers = #tpu.dot_dimension_numbers<[1], [0], [0], [1], [0, 0, 1, 1], [], []>} : vector<8x16xbf16>, vector<16x32xbf16>, vector<8x32xf32> -> vector<8x32xf32>
    %41 = arith.addf %36, %40 : vector<8x32xf32>
    %c0_29 = arith.constant 0 : index
    %c0_30 = arith.constant 0 : index
    %42 = vector.load %arg17[%c0_29, %c0_30] : memref<8x32xf32, #tpu.memory_space<vmem>>, vector<8x32xf32>
    tpu.vector_store %arg17[%c0_29, %c0_30], %41 {strides = array<i32>} : memref<8x32xf32, #tpu.memory_space<vmem>>, vector<8x32xf32>,
    %c1_i32 = arith.constant 1 : i32
    %43 = arith.cmpi eq, %arg1, %c1_i32 : i32
    %44 = arith.extui %43 : i1 to i32
    %c0_i32_31 = arith.constant 0 : i32
    %45 = arith.cmpi ne, %44, %c0_i32_31 : i32
    scf.if %45 {
      %c0_32 = arith.constant 0 : index
      %c0_33 = arith.constant 0 : index
      %46 = vector.load %arg17[%c0_32, %c0_33] : memref<8x32xf32, #tpu.memory_space<vmem>>, vector<8x32xf32>
      %47 = arith.addf %46, %4 : vector<8x32xf32>
      %c0_34 = arith.constant 0 : index
      %c0_35 = arith.constant 0 : index
      %48 = vector.load %arg7[%c0_34, %c0_35] : memref<1x32xf32, #tpu.memory_space<vmem>>, vector<1x32xf32>
      %c0_36 = arith.constant 0 : index
      %c0_37 = arith.constant 0 : index
      %49 = vector.load %arg8[%c0_36, %c0_37] : memref<1x32xf32, #tpu.memory_space<vmem>>, vector<1x32xf32>
      %cst_38 = arith.constant dense<0.000000e+00> : vector<8xf32>
      %50 = vector.multi_reduction <add>, %47, %cst_38 [1] : vector<8x32xf32> to vector<8xf32>
      %51 = vector.shape_cast %50 : vector<8xf32> to vector<8x1xf32>
      %cst_39 = arith.constant 3.200000e+01 : f32
      %52 = vector.broadcast %cst_39 : f32 to vector<8x1xf32>
      %53 = arith.divf %51, %52 : vector<8x1xf32>
      %54 = vector.broadcast %53 : vector<8x1xf32> to vector<8x32xf32>
      %55 = arith.subf %47, %54 : vector<8x32xf32>
      %56 = arith.mulf %55, %55 : vector<8x32xf32>
      %cst_40 = arith.constant dense<0.000000e+00> : vector<8xf32>
      %57 = vector.multi_reduction <add>, %56, %cst_40 [1] : vector<8x32xf32> to vector<8xf32>
      %58 = vector.shape_cast %57 : vector<8xf32> to vector<8x1xf32>
      %cst_41 = arith.constant 3.200000e+01 : f32
      %59 = vector.broadcast %cst_41 : f32 to vector<8x1xf32>
      %60 = arith.divf %58, %59 : vector<8x1xf32>
      %cst_42 = arith.constant 9.99999997E-7 : f32
      %61 = vector.broadcast %cst_42 : f32 to vector<8x1xf32>
      %62 = arith.addf %60, %61 : vector<8x1xf32>
      %63 = math.rsqrt %62 : vector<8x1xf32>
      %64 = vector.broadcast %63 : vector<8x1xf32> to vector<8x32xf32>
      %65 = arith.mulf %55, %64 : vector<8x32xf32>
      %66 = vector.broadcast %48 : vector<1x32xf32> to vector<8x32xf32>
      %67 = arith.mulf %65, %66 : vector<8x32xf32>
      %68 = vector.broadcast %49 : vector<1x32xf32> to vector<8x32xf32>
      %69 = arith.addf %67, %68 : vector<8x32xf32>
      %70 = arith.truncf %69 : vector<8x32xf32> to vector<8x32xbf16>
      %c0_43 = arith.constant 0 : index
      %c0_44 = arith.constant 0 : index
      %71 = vector.load %arg9[%c0_43, %c0_44] : memref<32x64xbf16, #tpu.memory_space<vmem>>, vector<32x64xbf16>
      %cst_45 = arith.constant dense<0.000000e+00> : vector<8x64xf32>
      %72 = tpu.matmul %70, %71, %cst_45 {dimension_numbers = #tpu.dot_dimension_numbers<[1], [0], [0], [1], [0, 0, 1, 1], [], []>} : vector<8x32xbf16>, vector<32x64xbf16>, vector<8x64xf32> -> vector<8x64xf32>
      %c0_46 = arith.constant 0 : index
      %c0_47 = arith.constant 0 : index
      %73 = vector.load %arg10[%c0_46, %c0_47] : memref<1x64xf32, #tpu.memory_space<vmem>>, vector<1x64xf32>
      %74 = vector.broadcast %73 : vector<1x64xf32> to vector<8x64xf32>
      %75 = arith.addf %72, %74 : vector<8x64xf32>
      %cst_48 = arith.constant 0.000000e+00 : f32
      %76 = vector.broadcast %cst_48 : f32 to vector<8x64xf32>
      %77 = arith.maximumf %75, %76 : vector<8x64xf32>
      %78 = arith.truncf %77 : vector<8x64xf32> to vector<8x64xbf16>
      %c0_49 = arith.constant 0 : index
      %c0_50 = arith.constant 0 : index
      %79 = vector.load %arg11[%c0_49, %c0_50] : memref<64x32xbf16, #tpu.memory_space<vmem>>, vector<64x32xbf16>
      %cst_51 = arith.constant dense<0.000000e+00> : vector<8x32xf32>
      %80 = tpu.matmul %78, %79, %cst_51 {dimension_numbers = #tpu.dot_dimension_numbers<[1], [0], [0], [1], [0, 0, 1, 1], [], []>} : vector<8x64xbf16>, vector<64x32xbf16>, vector<8x32xf32> -> vector<8x32xf32>
      %c0_52 = arith.constant 0 : index
      %c0_53 = arith.constant 0 : index
      %81 = vector.load %arg12[%c0_52, %c0_53] : memref<1x32xf32, #tpu.memory_space<vmem>>, vector<1x32xf32>
      %82 = vector.broadcast %81 : vector<1x32xf32> to vector<8x32xf32>
      %83 = arith.addf %80, %82 : vector<8x32xf32>
      %84 = arith.addf %83, %69 : vector<8x32xf32>
      %c0_54 = arith.constant 0 : index
      %c0_55 = arith.constant 0 : index
      %85 = vector.load %arg13[%c0_54, %c0_55] : memref<1x32xf32, #tpu.memory_space<vmem>>, vector<1x32xf32>
      %c0_56 = arith.constant 0 : index
      %c0_57 = arith.constant 0 : index
      %86 = vector.load %arg14[%c0_56, %c0_57] : memref<1x32xf32, #tpu.memory_space<vmem>>, vector<1x32xf32>
      %cst_58 = arith.constant dense<0.000000e+00> : vector<8xf32>
      %87 = vector.multi_reduction <add>, %84, %cst_58 [1] : vector<8x32xf32> to vector<8xf32>
      %88 = vector.shape_cast %87 : vector<8xf32> to vector<8x1xf32>
      %cst_59 = arith.constant 3.200000e+01 : f32
      %89 = vector.broadcast %cst_59 : f32 to vector<8x1xf32>
      %90 = arith.divf %88, %89 : vector<8x1xf32>
      %91 = vector.broadcast %90 : vector<8x1xf32> to vector<8x32xf32>
      %92 = arith.subf %84, %91 : vector<8x32xf32>
      %93 = arith.mulf %92, %92 : vector<8x32xf32>
      %cst_60 = arith.constant dense<0.000000e+00> : vector<8xf32>
      %94 = vector.multi_reduction <add>, %93, %cst_60 [1] : vector<8x32xf32> to vector<8xf32>
      %95 = vector.shape_cast %94 : vector<8xf32> to vector<8x1xf32>
      %cst_61 = arith.constant 3.200000e+01 : f32
      %96 = vector.broadcast %cst_61 : f32 to vector<8x1xf32>
      %97 = arith.divf %95, %96 : vector<8x1xf32>
      %cst_62 = arith.constant 9.99999997E-7 : f32
      %98 = vector.broadcast %cst_62 : f32 to vector<8x1xf32>
      %99 = arith.addf %97, %98 : vector<8x1xf32>
      %100 = math.rsqrt %99 : vector<8x1xf32>
      %101 = vector.broadcast %100 : vector<8x1xf32> to vector<8x32xf32>
      %102 = arith.mulf %92, %101 : vector<8x32xf32>
      %103 = vector.broadcast %85 : vector<1x32xf32> to vector<8x32xf32>
      %104 = arith.mulf %102, %103 : vector<8x32xf32>
      %105 = vector.broadcast %86 : vector<1x32xf32> to vector<8x32xf32>
      %106 = arith.addf %104, %105 : vector<8x32xf32>
      %c0_63 = arith.constant 0 : index
      %c0_64 = arith.constant 0 : index
      %c0_65 = arith.constant 0 : index
      %107 = vector.load %arg15[%c0_63, %c0_64, %c0_65] : memref<1x8x32xf32, #tpu.memory_space<vmem>>, vector<1x8x32xf32>
      %108 = vector.shape_cast %107 : vector<1x8x32xf32> to vector<8x32xf32>
      %109 = vector.shape_cast %106 : vector<8x32xf32> to vector<1x8x32xf32>
      tpu.vector_store %arg15[%c0_63, %c0_64, %c0_65], %109 {strides = array<i32>} : memref<1x8x32xf32, #tpu.memory_space<vmem>>, vector<1x8x32xf32>,
    } else {
    }
    return
  }
  func.func @transform_0(%arg0: i32, %arg1: i32) -> (i32, i32, i32) {
    %c0_i32 = arith.constant 0 : i32
    %c0_i32_0 = arith.constant 0 : i32
    %c0_i32_1 = arith.constant 0 : i32
    return %arg0, %c0_i32, %c0_i32_0 : i32, i32, i32
  }
  func.func @transform_1(%arg0: i32, %arg1: i32) -> (i32, i32, i32) {
    %c0_i32 = arith.constant 0 : i32
    %c0_i32_0 = arith.constant 0 : i32
    %c0_i32_1 = arith.constant 0 : i32
    return %arg1, %c0_i32, %c0_i32_0 : i32, i32, i32
  }
  func.func @transform_2(%arg0: i32, %arg1: i32) -> (i32, i32, i32) {
    %c0_i32 = arith.constant 0 : i32
    %c0_i32_0 = arith.constant 0 : i32
    %c0_i32_1 = arith.constant 0 : i32
    return %arg1, %c0_i32, %c0_i32_0 : i32, i32, i32
  }
  func.func @transform_3(%arg0: i32, %arg1: i32) -> (i32, i32, i32) {
    %c0_i32 = arith.constant 0 : i32
    %c0_i32_0 = arith.constant 0 : i32
    %c0_i32_1 = arith.constant 0 : i32
    return %arg1, %c0_i32, %c0_i32_0 : i32, i32, i32
  }
  func.func @transform_4(%arg0: i32, %arg1: i32) -> (i32, i32, i32) {
    %c0_i32 = arith.constant 0 : i32
    %c0_i32_0 = arith.constant 0 : i32
    %c0_i32_1 = arith.constant 0 : i32
    return %arg1, %c0_i32, %c0_i32_0 : i32, i32, i32
  }
  func.func @transform_5(%arg0: i32, %arg1: i32) -> (i32, i32) {
    %c0_i32 = arith.constant 0 : i32
    %c0_i32_0 = arith.constant 0 : i32
    %c0_i32_1 = arith.constant 0 : i32
    return %c0_i32, %c0_i32_0 : i32, i32
  }
  func.func @transform_6(%arg0: i32, %arg1: i32) -> (i32, i32) {
    %c0_i32 = arith.constant 0 : i32
    %c0_i32_0 = arith.constant 0 : i32
    %c0_i32_1 = arith.constant 0 : i32
    return %c0_i32, %c0_i32_0 : i32, i32
  }
  func.func @transform_7(%arg0: i32, %arg1: i32) -> (i32, i32) {
    %c0_i32 = arith.constant 0 : i32
    %c0_i32_0 = arith.constant 0 : i32
    %c0_i32_1 = arith.constant 0 : i32
    return %c0_i32, %c0_i32_0 : i32, i32
  }
  func.func @transform_8(%arg0: i32, %arg1: i32) -> (i32, i32) {
    %c0_i32 = arith.constant 0 : i32
    %c0_i32_0 = arith.constant 0 : i32
    %c0_i32_1 = arith.constant 0 : i32
    return %c0_i32, %c0_i32_0 : i32, i32
  }
  func.func @transform_9(%arg0: i32, %arg1: i32) -> (i32, i32) {
    %c0_i32 = arith.constant 0 : i32
    %c0_i32_0 = arith.constant 0 : i32
    %c0_i32_1 = arith.constant 0 : i32
    return %c0_i32, %c0_i32_0 : i32, i32
  }
  func.func @transform_10(%arg0: i32, %arg1: i32) -> (i32, i32) {
    %c0_i32 = arith.constant 0 : i32
    %c0_i32_0 = arith.constant 0 : i32
    %c0_i32_1 = arith.constant 0 : i32
    return %c0_i32, %c0_i32_0 : i32, i32
  }
  func.func @transform_11(%arg0: i32, %arg1: i32) -> (i32, i32) {
    %c0_i32 = arith.constant 0 : i32
    %c0_i32_0 = arith.constant 0 : i32
    %c0_i32_1 = arith.constant 0 : i32
    return %c0_i32, %c0_i32_0 : i32, i32
  }
  func.func @transform_12(%arg0: i32, %arg1: i32) -> (i32, i32) {
    %c0_i32 = arith.constant 0 : i32
    %c0_i32_0 = arith.constant 0 : i32
    %c0_i32_1 = arith.constant 0 : i32
    return %c0_i32, %c0_i32_0 : i32, i32
  }
  func.func @transform_13(%arg0: i32, %arg1: i32) -> (i32, i32, i32) {
    %c0_i32 = arith.constant 0 : i32
    %c0_i32_0 = arith.constant 0 : i32
    %c0_i32_1 = arith.constant 0 : i32
    return %arg0, %c0_i32, %c0_i32_0 : i32, i32, i32
  }
  func.func @transform_14(%arg0: i32, %arg1: i32) -> (i32, i32, i32, i32) {
    %c0_i32 = arith.constant 0 : i32
    %c0_i32_0 = arith.constant 0 : i32
    %c0_i32_1 = arith.constant 0 : i32
    return %arg0, %arg1, %c0_i32, %c0_i32_0 : i32, i32, i32, i32
  }
}

</mosaic_0001>

<bundles_post_ra>
// kernel: tpu_custom_call.1
= control target key start
LH: loop header
LB: loop body
LE: loop exit
PB: predicated region body
PF: predicated region fallthrough
CT: control target
= control target key end

     0   :  { %s2142_s0 = inlined_call_operand.vmem [shape: f32[2,8,32], index: 0, kind: input, shape index: {}]   ;;  %s2143_s1 = inlined_call_operand.vmem [shape: bf16[2,32,16], index: 1, kind: input, shape index: {}]   ;;  %s2144_s2 = inlined_call_operand.vmem [shape: bf16[2,32,16], index: 2, kind: input, shape index: {}]   ;;  %s2145_s3 = inlined_call_operand.vmem [shape: bf16[2,32,16], index: 3, kind: input, shape index: {}]   ;;  %s2146_s4 = inlined_call_operand.vmem [shape: bf16[2,16,32], index: 4, kind: input, shape index: {}]   ;;  %s2147_s5 = inlined_call_operand.vmem [shape: f32[1,32], index: 5, kind: input, shape index: {}]   ;;  %s2148_s6 = inlined_call_operand.vmem [shape: f32[1,32], index: 6, kind: input, shape index: {}]   ;;  %s2149_s7 = inlined_call_operand.vmem [shape: bf16[32,64], index: 7, kind: input, shape index: {}]   ;;  %s2150_s8 = inlined_call_operand.vmem [shape: f32[1,64], index: 8, kind: input, shape index: {}]   ;;  %s2151_s9 = inlined_call_operand.vmem [shape: bf16[64,32], index: 9, kind: input, shape index: {}]   ;;  %s2152_s10 = inlined_call_operand.vmem [shape: f32[1,32], index: 10, kind: input, shape index: {}]   ;;  %s2153_s11 = inlined_call_operand.vmem [shape: f32[1,32], index: 11, kind: input, shape index: {}]   ;;  %s2154_s12 = inlined_call_operand.vmem [shape: f32[1,32], index: 12, kind: input, shape index: {}]   ;;  %s2155_s13 = inlined_call_operand.hbm [shape: f32[2,8,32], index: 13, kind: output, shape index: {0}]   ;;  %s2156_s14 = inlined_call_operand.hbm [shape: f32[2,2,8,8], index: 14, kind: output, shape index: {1}]  }
   0x1   :  { %2179 = sst [smem:[#allocation26_spill]] %s2150_s8 }
   0x2   :  { %2180 = sst [smem:[#allocation27_spill]] %s2152_s10 }
   0x3   :  { %2181 = sst [smem:[#allocation28_spill]] %s2153_s11 }
   0x4   :  { %2182 = sst [smem:[#allocation29_spill]] %s2154_s12 }
   0x5   :  { %2183 = sst [smem:[#allocation30_spill]] %s2155_s13 }
   0x6   :  { %2184 = sst [smem:[#allocation31_spill]] %s2156_s14 }
   0x7   :  { %20 = vsyncpa [#allocation4], 0 }
   0x8   :  { %22 = vsyncpa [#allocation4 + $0x1], 0 }
   0x9   :  { %23 = vsyncpa [#allocation6], 0 }
   0xa   :  { %25 = vsyncpa [#allocation6 + $0x1], 0  ;;  %s1822_s29 = smov 0   ;;  %s1824_s30 = smov 0  }
   0xb   :  { %s1826_s15 = smov 0   ;;  %s1828_s16 = smov 0  }
   0xc   :  { %s1830_s17 = smov 0   ;;  %s1832_s18 = smov 0  }
   0xd   :  { %s1834_s19 = smov 0   ;;  %s1836_s20 = smov 0  }
   0xe   :  { %s1838_s21 = smov 0   ;;  %s1840_s22 = smov 0  }
   0xf   :  { %s1842_s23 = smov 0  }
  0x10 LB: > { %2185 = sst [smem:[#allocation9_spill]] %s1698_s29  ;;  %s1321_s24 = sadd.s32 4294967295, %s1738_s23   ;;  %s1738_s23 = sphi %s1842_s23, %s31_s23   ;;  %s1734_s22 = sphi %s1840_s22, %s2235_s22   ;;  %s1730_s21 = sphi %s1838_s21, %s2234_s21   ;;  %s1726_s20 = sphi %s1836_s20, %s2233_s20   ;;  %s1722_s19 = sphi %s1834_s19, %s2232_s19   ;;  %s1718_s18 = sphi %s1832_s18, %s2231_s18   ;;  %s1714_s17 = sphi %s1830_s17, %s2230_s17   ;;  %s1710_s16 = sphi %s1828_s16, %s2229_s16   ;;  %s1706_s15 = sphi %s1826_s15, %s2228_s15   ;;  %s1702_s30 = sphi %s1824_s30, %s2227_s30   ;;  %s1698_s29 = sphi %s1822_s29, %s2226_s29  }
  0x11   : > { %2186 = sst [smem:[#allocation10_spill]] %s1702_s30  ;;  %s1322_s25 = sadd.s32 4294967294, %s1738_s23  }
  0x12   : > { %2187 = sst [smem:[#allocation11_spill]] %s1706_s15  ;;  %s40_s26 = sadd.s32 1, %s1730_s21 }
  0x13   : > { %2188 = sst [smem:[#allocation12_spill]] %s1710_s16  ;;  %s43_s27 = sadd.s32 1, %s1734_s22 }
  0x14   : > { %2189 = sst [smem:[#allocation13_spill]] %s1714_s17  ;;  %p41_p0 = scmp.ge.s32.totalorder %s40_s26, 2 }
  0x15   : > { %2190 = sst [smem:[#allocation14_spill]] %s1718_s18  ;;  %s348_s28 = sadd.s32 1, %s1718_s18 }
  0x16   : > { %2191 = sst [smem:[#allocation15_spill]] %s1730_s21  ;;  %p358_p1 = scmp.ne.s32.totalorder %s1718_s18, %s1714_s17 }
  0x17   : > { %2192 = sst [smem:[#allocation16_spill]] %s1734_s22  ;;  %p1884_p2 = scmp.eq.s32.totalorder %s1321_s24, 3 }
  0x18   : > { %2193 = sst [smem:[#allocation17_spill]] %s1738_s23  ;;  %s2237_s26 = smov (%p41_p0, %s40_s26), 0 }
  0x19   : > { %2195 = sst [smem:[#allocation18_spill]] %s2237_s26  ;;  %s2239_s27 = smov (!%p41_p0, %s43_s27), %s1734_s22 }
  0x1a   : > { %p1893_p3 = por %p1884_p2, %p358_p1  ;;  %p364_p4 = scmp.ne.s32.totalorder %s1714_s17, %s1710_s16 }
  0x1b   : > { %p45_p5 = scmp.ge.s32.totalorder %s2239_s27, 2  ;;  %p1899_p6 = scmp.eq.s32.totalorder %s1322_s25, 3 }
  0x1c   : > { %s2196_s13 = scalar_select %p1893_p3, 1, 0 }
  0x1d   : > { %s372_s12 = ssub.s32 %s1730_s21, %s2237_s26  ;;  %s376_s11 = sadd.s32 1, %s1706_s15 }
  0x1e   : > { %2197 = sst [smem:[#allocation19_spill]] %s2196_s13  ;;  %s2241_s27 = smov (%p45_p5, %s2239_s27), 0 }
  0x1f   : > { %2199 = sst [smem:[#allocation20_spill]] %s2241_s27  ;;  %p1910_p7 = por %p1899_p6, %p364_p4 }
  0x20   : > { %p386_p8 = scmp.ne.s32.totalorder %s1706_s15, %s1702_s30  ;;  %s345_s16 = ssub.s32 %s1734_s22, %s2241_s27 }
  0x21   : > { %s2200_s10 = scalar_select %p1910_p7, 1, 0 }
  0x22   : > { %p392_p9 = scmp.ne.s32.totalorder %s1702_s30, %s1698_s29  ;;  %p346_p10 = scmp.eq.s32.totalorder %s345_s16, 0 }
  0x23   : > { %2201 = sst [smem:[#allocation21_spill]] %s2200_s10  ;;  %s373_s25 = sor.u32 %s372_s12, %s345_s16 }
  0x24   : > { %p374_p11 = scmp.eq.s32.totalorder %s373_s25, 0  ;;  %p1922_p12 = por %p386_p8, %p1884_p2 }
  0x25   : > { %s1927_s26 = scalar_select %p346_p10, %s1718_s18, %s348_s28  }
  0x26   : > { %s2202_s13 = scalar_select %p1922_p12, 1, 0 }
  0x27   : > { %2204 = sst [smem:[#allocation23_spill]] %s1927_s26  ;;  %p1934_p13 = por %p392_p9, %p1899_p6 }
  0x28   : > { %2203 = sst [smem:[#allocation22_spill]] %s2202_s13  ;;  %p1325_p0 = scmp.ge.s32.totalorder %s1738_s23, 1 }
  0x29   : > { %s1930_s21 = scalar_select %p374_p11, %s1706_s15, %s376_s11  }
  0x2a   : > { %s2206_s8 = scalar_select %p1934_p13, 1, 0 }
  0x2b   : > { %2205 = sst [smem:[#allocation24_spill]] %s1930_s21  ;;  %p474_p1 = scmp.lt.s32.totalorder %s1738_s23, 5 }
  0x2c   : > { %2207 = sst [smem:[#allocation25_spill]] %s2206_s8 }
  0x2d   : > { %p475_p4 = pnand %p1325_p0, %p474_p1 }
  0x2e   : > { %s2168_s12 = sand.u32 (!%p475_p4), 1, %s1714_s17   ;;  %s2171_s11 = sand.u32 (!%p475_p4), 1, %s1702_s30  }
  0x2f   : > { %478 = sbr.rel (%p475_p4) target bundleno = 2374 (0x946), region = 72  ;;  %s1944_s14 = sshll.u32 (!%p475_p4), %s2168_s12, 3 }
  0x30   : > { %s1948_s16 = sshll.u32 (!%p475_p4), %s2171_s11, 3  ;;  %p544_p2 = scmp.lt.s32.totalorder (!%p475_p4), %s1726_s20, 1 }
  0x31   : > { %p548_p5 = scmp.lt.s32.totalorder (!%p475_p4), %s1722_s19, 1  ;;  %s536_s27 = scalar_lea.vmem (!%p475_p4), [#allocation3], %s1944_s14 }
  0x32   : > { %p1337_p6 = scmp.ne.s32.totalorder (!%p475_p4), %s1722_s19, 0 }
  0x36   : > { %s545_s28 = scalar_select %p544_p2, %s1726_s20, 1 }
  0x37   : > { %s549_s24 = scalar_select %p548_p5, %s1722_s19, 1 }
  0x38   : > { %s1328_s25 = sshll.u32 %s545_s28, 3  ;;  %572 = sbr.rel (%p1337_p6) target bundleno = 63 (0x3f), region = 76  ;;  %vm573_vm0 = vcmask (!%p1337_p6), 261120   ;;  %v1740_v0 = vmov (!%p1337_p6), 0.0  }
  0x39   : > { %s547_s26 = scalar_lea.vmem %s2142_s0, %s1328_s25  ;;  %s1373_s18 = sshll.u32 %s549_s24, 4  ;;  %574 = vst.msk [vmem:[#allocation2] sm:$0xff] (!%p1337_p6), %vm573_vm0, %v1740_v0 }
  0x3a   : > { %s552_s12 = scalar_lea.vmem %s2143_s1, %s1373_s18  ;;  %s557_s11 = scalar_lea.vmem %s2144_s2, %s1373_s18 }
  0x3b   : > { %s1966_s13 = scalar_lea.vmem %s2145_s3, %s1373_s18  ;;  %s1376_s30 = sshll.u32 %s549_s24, 3 }
  0x3c   : > { %s1971_s22 = scalar_lea.vmem %s2146_s4, %s1376_s30  ;;  %s543_s25 = scalar_lea.vmem [#allocation5], %s1948_s16 }
  0x3f PF: > { %v1567_v1 = vld [vmem:[%s557_s11] sm:$0xff]   ;;  %v1741_v2 = vmov 0.0   ;;  %v1569_v4 = vld [vmem:[%s557_s11 + $0x8] sm:$0xff]   ;;  %vm1742_vm1 = vmmov 0   ;;  %vm593_vm2 = vcmask 261120   ;;  %vm752_vm3 = vcmask 130048  }
  0x40   : > { %1408 = vmatprep.subr.bf16.mxu1 %v1741_v2  ;;  %1400 = vmatprep.subr.bf16.mxu0 %v1741_v2  ;;  %v1568_v3 = vld [vmem:[%s552_s12] sm:$0xff]   ;;  %v1570_v6 = vld [vmem:[%s552_s12 + $0x8] sm:$0xff]   ;;  %vm799_vm4 = vcmask 64512   ;;  %vm817_vm5 = vcmask 1043456   ;;  %p1351_p8 = scmp.ne.s32.totalorder %s1722_s19, 1 }
  0x41   : > { %1409 = vmatpush3.bf16.msra.mxu1 %v1567_v1  ;;  %1412 = vmatprep.mubr.msk.bf16.mxu1 %vm1742_vm1, %v1741_v2  ;;  %v1977_v5 = vld [vmem:[%s547_s26] sm:$0xff]  ;;  %v1572_v21 = vld [vmem:[%s1966_s13 + $0x8] sm:$0xff]   ;;  %v1743_v63 = vmov (!%p1351_p8), 0.0   ;;  %vm1744_vm6 = vmmov (!%p1351_p8), 0   ;;  %vm1060_vm7 = vcmask (!%p1351_p8), 523264   ;;  %s2209_s15 = sld [smem:[#allocation27_spill]] (!%p1351_p8) }
  0x42   : > { %1410 = vmatprep.subr.bf16.mxu1 %v1741_v2  ;;  %1401 = vmatpush3.bf16.msra.mxu0 %v1568_v3  ;;  %v576_v7 = vpack.c.bf16 %v1977_v5, %v1977_v5  ;;  %v1571_v20 = vld [vmem:[%s1966_s13] sm:$0xff]   ;;  %v1579_v0 = vld [vmem:[%s2149_s7 + $0x8] sm:$0xff] (!%p1351_p8)   ;;  %s2208_s13 = sld [smem:[#allocation26_spill]] (!%p1351_p8)  ;;  %s2210_s21 = sld [smem:[#allocation28_spill]] (!%p1351_p8) }
  0x43   : > { %1402 = vmatprep.subr.bf16.mxu0 %v1741_v2  ;;  %1404 = vmatprep.mubr.msk.bf16.mxu0 %vm1742_vm1, %v1741_v2  ;;  %v1573_v38 = vld [vmem:[%s1971_s22] sm:$0xff]   ;;  %s2211_s12 = sld [smem:[#allocation29_spill]] (!%p1351_p8) }
  0x44   : > { %v861_v48 = vld [vmem:[#allocation2] sm:$0xff] }
  0x45   : > { %1411 = vmatpush3.bf16.msra.mxu1 %v1569_v4  ;;  %v1578_v62 = vld [vmem:[%s2149_s7] sm:$0xff] (!%p1351_p8)  }
  0x46   : > { %1403 = vmatpush3.bf16.msra.mxu0 %v1570_v6  ;;  %1424 = vmatprep.subr.bf16.mxu1 %v1741_v2  ;;  %v1580_v1 = vld [vmem:[%s2151_s9] sm:$0xff] (!%p1351_p8)  }
  0x47   : > { %1416 = vmatprep.subr.bf16.mxu0 %v1741_v2 }
  0x48   : > { %1413 = vmatmul.mubr.msk.bf16.vlgmr.msra.gmra.mrb[0].mxu1 %vm593_vm2, %v576_v7 }
  0x49   : > { %1405 = vmatmul.mubr.msk.bf16.vlgmr.msra.gmra.mrb[0].mxu0 %vm593_vm2, %v576_v7  ;;  %1426 = vmatprep.mubr.msk.bf16.mxu1 %vm1742_vm1, %v1741_v2 }
  0x4a   : > { %1420 = vmatprep.mubr.msk.bf16.mxu0 %vm1742_vm1, %v1741_v2  ;;  %1417 = vmatpush3.bf16.msra.mxu0 %v1571_v20 }
  0x4b   : > { %1418 = vmatprep.subr.bf16.mxu0 %v1741_v2 }
  0x4e   : > { %1419 = vmatpush3.bf16.msra.mxu0 %v1572_v21 }
  0x4f   : > { %1430 = vmatprep.subr.bf16.mxu0 %v1741_v2 }
  0x51   : > { %1421 = vmatmul.mubr.msk.bf16.vlgmr.msra.gmra.mrb[4].mxu0 %vm593_vm2, %v576_v7  ;;  %v1352_v7 = vld [vmem:[%s2147_s5] ss:$0 sm:$0xff] (!%p1351_p8) }
  0x52   : > { %1432 = vmatprep.mubr.msk.bf16.mxu0 %vm1742_vm1, %v1741_v2 }
 0x11b   : > { %v687_v8 = vpop.f32.mrb[0].mxu1 }
 0x11c   : > { %v751_v9 = vpack.c.bf16 %v687_v8, %v687_v8  ;;  %v1414_v10 = vpop.f32.mrb[1].mxu1  ;;  %v631_v11 = vpop.f32.mrb[0].mxu0 }
 0x11d   : > { %v690_v12 = vpop.f32.mrb[2].mxu1  ;;  %v1406_v13 = vpop.f32.mrb[1].mxu0  ;;  %v749_v16 = vmul.f32 0.25, %v631_v11 }
 0x11e   : > { %v757_v14 = vsel %vm752_vm3, %v751_v9, 0  ;;  %v1415_v15 = vpop.f32.mrb[3].mxu1  ;;  %v634_v17 = vpop.f32.mrb[2].mxu0  ;;  %v1353_v9 = vld [vmem:[%s2148_s6] ss:$0 sm:$0xff] (!%p1351_p8)  ;;  %v1582_v13 = vld [vmem:[%s2151_s9 + $0x10] sm:$0xff] (!%p1351_p8)  }
 0x11f   : > { %1425 = vmatpush3.bf16.xpose.msra.mxu1 %v757_v14  ;;  %v1407_v18 = vpop.f32.mrb[3].mxu0  ;;  %v750_v19 = vpack.c.bf16 %v749_v16, %v749_v16  ;;  %v1583_v14 = vld [vmem:[%s2151_s9 + $0x18] sm:$0xff] (!%p1351_p8)   ;;  %v1354_v15 = vld [vmem:[%s2208_s13] ss:$0 sm:$0xff] (!%p1351_p8) }
 0x120   : > { %1436 = vmatprep.subr.bf16.mxu1 %v1741_v2 }
 0x124   : > { %v743_v32 = vpop.f32.mrb[4].mxu0 }
 0x125   : > { %v1422_v33 = vpop.f32.mrb[5].mxu0  ;;  %v813_v36 = vpack.c.bf16 %v743_v32, %v743_v32 }
 0x126   : > { %1427 = vmatmul.mubr.msk.bf16.vlgmr.msra.gmra.mrb[4].mxu1 %vm752_vm3, %v750_v19  ;;  %v746_v34 = vpop.f32.mrb[6].mxu0 }
 0x127   : > { %1438 = vmatprep.mubr.msk.bf16.mxu1 %vm1742_vm1, %v1741_v2  ;;  %v1423_v35 = vpop.f32.mrb[7].mxu0  ;;  %v819_v37 = vsel %vm817_vm5, %v813_v36, 0  ;;  %1437 = vmatpush3.bf16.msra.mxu1 %v1573_v38  ;;  %v1581_v2 = vld [vmem:[%s2151_s9 + $0x8] sm:$0xff] (!%p1351_p8)  }
 0x128   : > { %1431 = vmatpush3.bf16.msra.mxu0 %v819_v37  ;;  %1450 = vmatprep.subr.bf16.mxu1 (!%p1351_p8), %v1743_v63 }
 0x129   : > { %1442 = vmatprep.subr.bf16.mxu0 (!%p1351_p8), %v1743_v63 }
 0x1f9   : > { %v793_v22 = vpop.f32.mrb[4].mxu1 }
 0x1fa   : > { %v1428_v23 = vpop.f32.mrb[5].mxu1  ;;  %v800_v24 = vsel %vm799_vm4, %v793_v22, -inf }
 0x1fb   : > { %801 = vmax.xlane.f32.xlu0 %v800_v24  ;;  %v796_v25 = vpop.f32.mrb[6].mxu1  ;;  %v1358_v23 = vld [vmem:[%s2209_s15] ss:$0 sm:$0xff] (!%p1351_p8) }
 0x1fc   : > { %v1429_v26 = vpop.f32.mrb[7].mxu1 }
 0x288   : > { %v802_v27 = vpop.xlane.xlu0 %801 }
 0x289   : > { %v803_v28 = vsub.f32 %v793_v22, %v802_v27 }
 0x28b   : > { %v804_v29 = vmul.f32 1.442695, %v803_v28 }
 0x28d   : > { %1574 = vpow2.f32 %v804_v29 }
 0x297   : > { %v1575_v30 = vpop.eup %1574 }
 0x298   : > { %v806_v31 = vsel %vm799_vm4, %v1575_v30, 0.0 }
 0x299   : > { %807 = vadd.xlane.f32.xlu0 %v806_v31 }
 0x326   : > { %v808_v39 = vpop.xlane.xlu0 %807 }
 0x327   : > { %1576 = vrcp.f32 %v808_v39 }
 0x331   : > { %v1577_v40 = vpop.eup %1576 }
 0x332   : > { %v810_v41 = vmul.f32 %v1577_v40, %v1575_v30  ;;  %v1364_v40 = vld [vmem:[%s2210_s21] ss:$0 sm:$0xff] (!%p1351_p8) }
 0x334   : > { %811 = vst.msk [vmem:[%s543_s25] sm:$0xff] %vm799_vm4, %v810_v41  ;;  %v812_v42 = vpack.c.bf16 %v810_v41, %v810_v41 }
 0x336   : > { %1433 = vmatmul.mubr.msk.bf16.vlgmr.msra.gmra.mrb[8].mxu0 %vm799_vm4, %v812_v42  ;;  %v1365_v42 = vld [vmem:[%s2211_s12] ss:$0 sm:$0xff] (!%p1351_p8) }
 0x337   : > { %1446 = vmatprep.mubr.msk.bf16.mxu0 (!%p1351_p8), %vm1744_vm6, %v1743_v63  ;;  %1443 = vmatpush3.bf16.msra.mxu0 (!%p1351_p8), %v1578_v62 }
 0x338   : > { %1444 = vmatprep.subr.bf16.mxu0 (!%p1351_p8), %v1743_v63 }
 0x33b   : > { %1445 = vmatpush3.bf16.msra.mxu0 (!%p1351_p8), %v1579_v0 }
 0x409   : > { %v855_v43 = vpop.f32.mrb[8].mxu0 }
 0x40a   : > { %v862_v44 = vpack.c.bf16 %v855_v43, %v855_v43  ;;  %v1434_v45 = vpop.f32.mrb[9].mxu0 }
 0x40b   : > { %v858_v46 = vpop.f32.mrb[10].mxu0 }
 0x40c   : > { %v1435_v47 = vpop.f32.mrb[11].mxu0  ;;  %1439 = vmatmul.mubr.msk.bf16.vlgmr.msra.gmra.mrb[8].mxu1 %vm752_vm3, %v862_v44 }
 0x40d   : > { %1458 = vmatprep.mubr.msk.bf16.mxu1 (!%p1351_p8), %vm1744_vm6, %v1743_v63  ;;  %1451 = vmatpush3.bf16.msra.mxu1 (!%p1351_p8), %v1580_v1 }
 0x40e   : > { %1452 = vmatprep.subr.bf16.mxu1 (!%p1351_p8), %v1743_v63 }
 0x411   : > { %1453 = vmatpush3.bf16.msra.mxu1 (!%p1351_p8), %v1581_v2 }
 0x412   : > { %1454 = vmatprep.subr.bf16.mxu1 (!%p1351_p8), %v1743_v63 }
 0x415   : > { %1455 = vmatpush3.bf16.msra.mxu1 (!%p1351_p8), %v1582_v13 }
 0x416   : > { %1456 = vmatprep.subr.bf16.mxu1 (!%p1351_p8), %v1743_v63 }
 0x419   : > { %1457 = vmatpush3.bf16.msra.mxu1 (!%p1351_p8), %v1583_v14 }
 0x4dc   : > { %919 = sbr.rel (%p1351_p8) target bundleno = 2323 (0x913), region = 80 }
 0x4df   : > { %v908_v49 = vpop.f32.mrb[8].mxu1 }
 0x4e0   : > { %v914_v50 = vadd.f32 %v908_v49, %v861_v48  ;;  %v1440_v51 = vpop.f32.mrb[9].mxu1 }
 0x4e1   : > { %v911_v52 = vpop.f32.mrb[10].mxu1 }
 0x4e2   : > { %915 = vst.msk [vmem:[#allocation2] sm:$0xff] %vm593_vm2, %v914_v50  ;;  %v1441_v53 = vpop.f32.mrb[11].mxu1 }
 0x4e9   : > { %v920_v54 = vld [vmem:[#allocation2] sm:$0xff] }
 0x4ea   : > { %v921_v55 = vadd.f32 %v920_v54, %v1977_v5 }
 0x4ec   : > { %v924_v56 = vsel %vm593_vm2, %v921_v55, 0.0 }
 0x4ed   : > { %925 = vadd.xlane.f32.xlu0 %v924_v56 }
 0x57a   : > { %v926_v57 = vpop.xlane.xlu0 %925 }
 0x57b   : > { %v928_v58 = vmul.f32 0.03125, %v926_v57 }
 0x57d   : > { %v929_v59 = vsub.f32 %v921_v55, %v928_v58 }
 0x57f   : > { %v930_v60 = vmul.f32 %v929_v59, %v929_v59 }
 0x581   : > { %v931_v61 = vsel %vm593_vm2, %v930_v60, 0.0 }
 0x582   : > { %932 = vadd.xlane.f32.xlu0 %v931_v61 }
 0x60f   : > { %v933_v3 = vpop.xlane.xlu0 %932 }
 0x610   : > { %v934_v4 = vmul.f32 0.03125, %v933_v3 }
 0x612   : > { %v935_v5 = vadd.f32 1e-06, %v934_v4 }
 0x614   : > { %1584 = vrsqrt.f32 %v935_v5 }
 0x61e   : > { %v1585_v6 = vpop.eup %1584 }
 0x61f   : > { %v937_v8 = vmul.f32 %v1585_v6, %v929_v59 }
 0x621   : > { %v944_v10 = vmul.f32 %v1352_v7, %v937_v8 }
 0x623   : > { %v951_v11 = vadd.f32 %v1353_v9, %v944_v10 }
 0x625   : > { %v952_v12 = vpack.c.bf16 %v951_v11, %v951_v11 }
 0x627   : > { %1447 = vmatmul.mubr.msk.bf16.vlgmr.msra.gmra.mrb[0].mxu0 %vm593_vm2, %v952_v12 }
 0x6fa   : > { %v1013_v16 = vpop.f32.mrb[0].mxu0 }
 0x6fb   : > { %v1014_v17 = vadd.f32 %v1354_v15, %v1013_v16  ;;  %v1448_v18 = vpop.f32.mrb[1].mxu0 }
 0x6fc   : > { %v1016_v19 = vpop.f32.mrb[2].mxu0 }
 0x6fd   : > { %v1019_v20 = vmax.f32 %v1014_v17, 0.0  ;;  %v1449_v21 = vpop.f32.mrb[3].mxu0 }
 0x6ff   : > { %v1020_v22 = vpack.c.bf16 %v1019_v20, %v1019_v20 }
 0x701   : > { %1459 = vmatmul.mubr.msk.bf16.vlgmr.msra.gmra.mrb[0].mxu1 %vm1060_vm7, %v1020_v22 }
 0x7d4   : > { %v1098_v24 = vpop.f32.mrb[0].mxu1 }
 0x7d5   : > { %v1099_v25 = vadd.f32 %v1358_v23, %v1098_v24  ;;  %v1460_v26 = vpop.f32.mrb[1].mxu1 }
 0x7d6   : > { %v1101_v27 = vpop.f32.mrb[2].mxu1 }
 0x7d7   : > { %v1461_v28 = vpop.f32.mrb[3].mxu1  ;;  %v1104_v29 = vadd.f32 %v1099_v25, %v951_v11 }
 0x7d9   : > { %v1107_v30 = vsel %vm593_vm2, %v1104_v29, 0.0 }
 0x7da   : > { %1108 = vadd.xlane.f32.xlu1 %v1107_v30 }
 0x867   : > { %v1109_v31 = vpop.xlane.xlu1 %1108 }
 0x868   : > { %v1110_v32 = vmul.f32 0.03125, %v1109_v31 }
 0x86a   : > { %v1111_v33 = vsub.f32 %v1104_v29, %v1110_v32 }
 0x86c   : > { %v1112_v34 = vmul.f32 %v1111_v33, %v1111_v33 }
 0x86e   : > { %v1113_v35 = vsel %vm593_vm2, %v1112_v34, 0.0 }
 0x86f   : > { %1114 = vadd.xlane.f32.xlu1 %v1113_v35 }
 0x8fc   : > { %v1115_v36 = vpop.xlane.xlu1 %1114 }
 0x8fd   : > { %v1116_v37 = vmul.f32 0.03125, %v1115_v36 }
 0x8ff   : > { %v1117_v38 = vadd.f32 1e-06, %v1116_v37 }
 0x901   : > { %1586 = vrsqrt.f32 %v1117_v38 }
 0x90b   : > { %v1587_v39 = vpop.eup %1586 }
 0x90c   : > { %v1119_v41 = vmul.f32 %v1587_v39, %v1111_v33 }
 0x90e   : > { %v1126_v43 = vmul.f32 %v1364_v40, %v1119_v41 }
 0x910   : > { %v1133_v44 = vadd.f32 %v1365_v42, %v1126_v43 }
 0x912   : > { %1134 = vst.msk [vmem:[%s536_s27] sm:$0xff] %vm593_vm2, %v1133_v44 }
 0x913 PF: > { %s2212_s11 = sld [smem:[#allocation13_spill]]  ;;  %s1368_s28 = sshll.u32 %s1726_s20, 7 }
 0x914   : > { %s2214_s10 = sld [smem:[#allocation30_spill]]  ;;  %s1154_s29 = sshll.u32 %s536_s27, 4  ;;  %s1155_s29 = int_to_ptr.vmem [resolvable:$true] %s1154_s29 }
 0x915   : > { %s1588_s17 = scalar_lea.vmem %s1155_s29, 128  ;;  %s1745_s18 = smov [#allocation3]  }
 0x916   : > { %p1589_p9 = scmp.ne.s32.totalorder %s1155_s29, %s1588_s17  ;;  %s1592_s21 = sshll.u32 %s1745_s18, 4  ;;  %s1593_s21 = int_to_ptr.vmem [resolvable:$false] %s1592_s21 }
 0x917   : > { %s1594_s23 = scalar_lea.vmem %s1593_s21, 256  ;;  %p1595_p0 = scmp.lt.s32.totalorder %s1155_s29, %s1593_s21 }
 0x918   : > { %p1590_p10 = pnand %p1589_p9, %p1893_p3  ;;  %p1596_p1 = scmp.lt.s32.totalorder %s1594_s23, %s1588_s17 }
 0x919   : > { %s2215_s30 = sand.u32 1, %s2212_s11  }
 0x91a   : > { %s2052_s13 = scalar_lea.hbm %s2214_s10, %s1368_s28  ;;  %s1136_s15 = scalar_lea.sflag [#allocation4], %s2215_s30 }
 0x91b   : > { %p1591_p11 = pneg %p1590_p10  ;;  %p1597_p4 = por %p1596_p1, %p1595_p0 }
 0x91d   : > { %p1598_p2 = pnand %p1597_p4, %p1591_p11 }
 0x91f   : > { %1601 = shalt.err (!%p1598_p2)
}
 0x920   : > { %s1602_s14 = scalar_lea.hbm %s2052_s13, 128  ;;  %s1606_s12 = scalar_lea.hbm %s2214_s10, 256 }
 0x921   : > { %p1603_p5 = scmp.ne.s32.totalorder %s2052_s13, %s1602_s14  ;;  %p1607_p9 = scmp.lt.u32.totalorder %s2052_s13, %s2214_s10 }
 0x922   : > { %p1608_p10 = scmp.lt.u32.totalorder %s1606_s12, %s1602_s14  ;;  %p1610_p0 = scmp.lt.u32.totalorder %s1602_s14, %s2052_s13 }
 0x923   : > { %p1604_p6 = pnand %p1603_p5, %p1893_p3 }
 0x924   : > { %p1609_p11 = por %p1608_p10, %p1607_p9 }
 0x925   : > { %p1605_p8 = pneg %p1604_p6 }
 0x926   : > { %p1611_p1 = por %p1610_p0, %p1609_p11 }
 0x928   : > { %p1612_p4 = pnand %p1611_p1, %p1605_p8 }
 0x92a   : > { %1615 = shalt.err (!%p1612_p4)
}
 0x92b   : > { %s2216_s22 = sld [smem:[#allocation10_spill]]  ;;  %s1369_s30 = sshll.u32 %s1726_s20, 1 }
 0x92c   : > { %1462 = dma.vmem_to_hbm [thread:$0]  (%p1893_p3), %s1155_s29, 128, %s2052_s13, %s1136_s15  }
 0x92d   : > { %s1169_s17 = sshll.u32 %s543_s25, 4  ;;  %s1165_s18 = sadd.s32 %s1722_s19, %s1369_s30  ;;  %s2079_s17 = int_to_ptr.vmem [resolvable:$true] %s1169_s17 }
 0x92e   : > { %s1370_s21 = sshll.u32 %s1165_s18, 7  ;;  %s2218_s24 = sld [smem:[#allocation31_spill]] }
 0x92f   : > { %s1616_s11 = scalar_lea.vmem %s2079_s17, 128  ;;  %s1746_s20 = smov [#allocation5]  }
 0x930   : > { %p1617_p2 = scmp.ne.s32.totalorder %s2079_s17, %s1616_s11  ;;  %s1620_s16 = sshll.u32 %s1746_s20, 4  ;;  %s1621_s16 = int_to_ptr.vmem [resolvable:$false] %s1620_s16 }
 0x931   : > { %s2219_s26 = sand.u32 1, %s2216_s22   ;;  %s1622_s19 = scalar_lea.vmem %s1621_s16, 256 }
 0x932   : > { %s1141_s12 = scalar_lea.sflag [#allocation6], %s2219_s26  ;;  %p1618_p3 = pnand %p1617_p2, %p1922_p12 }
 0x933   : > { %p1623_p6 = scmp.lt.s32.totalorder %s2079_s17, %s1621_s16  ;;  %p1624_p8 = scmp.lt.s32.totalorder %s1622_s19, %s1616_s11 }
 0x934   : > { %s1167_s27 = scalar_lea.hbm %s2218_s24, %s1370_s21  ;;  %p1619_p5 = pneg %p1618_p3 }
 0x935   : > { %p1625_p9 = por %p1624_p8, %p1623_p6 }
 0x937   : > { %p1626_p10 = pnand %p1625_p9, %p1619_p5 }
 0x939   : > { %1629 = shalt.err (!%p1626_p10)
}
 0x93a   : > { %s1630_s25 = scalar_lea.hbm %s1167_s27, 128  ;;  %s1634_s15 = scalar_lea.hbm %s2218_s24, 512 }
 0x93b   : > { %p1631_p11 = scmp.ne.s32.totalorder %s1167_s27, %s1630_s25  ;;  %p1635_p4 = scmp.lt.u32.totalorder %s1167_s27, %s2218_s24 }
 0x93c   : > { %p1636_p2 = scmp.lt.u32.totalorder %s1634_s15, %s1630_s25  ;;  %p1638_p13 = scmp.lt.u32.totalorder %s1630_s25, %s1167_s27 }
 0x93d   : > { %p1632_p0 = pnand %p1631_p11, %p1922_p12 }
 0x93e   : > { %p1637_p3 = por %p1636_p2, %p1635_p4 }
 0x93f   : > { %p1633_p1 = pneg %p1632_p0 }
 0x940   : > { %p1639_p6 = por %p1638_p13, %p1637_p3 }
 0x942   : > { %p1640_p5 = pnand %p1639_p6, %p1633_p1 }
 0x944   : > { %1643 = shalt.err (!%p1640_p5)
}
 0x945   : > { %1463 = dma.vmem_to_hbm [thread:$0]  (%p1922_p12), %s2079_s17, 128, %s1167_s27, %s1141_s12  }
 0x946 PF: > { %s2220_s30 = sld [smem:[#allocation17_spill]]  ;;  %s2221_s18 = sld [smem:[#allocation12_spill]] }
 0x94c   : > { %p1473_p8 = scmp.ge.s32.totalorder %s2220_s30, 2  ;;  %s1181_s23 = sand.u32 1, %s2221_s18  }
 0x94d   : > { %s1182_s14 = scalar_lea.sflag [#allocation4], %s1181_s23 }
 0x94e   : > { %p1467_p9 = pnand %p1473_p8, %p1910_p7 }
 0x950   : > { %1689 = dma.done.wait (!%p1467_p9), %s1182_s14, 128  }
 0x951   : > { %1691 = vsyncadd (!%p1467_p9), %s1182_s14, 4294967168  ;;  %s2223_s26 = sld [smem:[#allocation9_spill]]  ;;  %s2224_s11 = sld [smem:[#allocation25_spill]] }
 0x957   : > { %s1190_s20 = sand.u32 1, %s2223_s26   ;;  %p2225_p13 = scmp.ne.s32.totalorder %s2224_s11, 0 }
 0x958   : > { %s1191_s16 = scalar_lea.sflag [#allocation6], %s1190_s20 }
 0x959   : > { %p1470_p10 = pnand %p1473_p8, %p2225_p13 }
 0x95b   : > { %1693 = dma.done.wait (!%p1470_p10), %s1191_s16, 128  }
 0x95c   : > { %1695 = vsyncadd (!%p1470_p10), %s1191_s16, 4294967168  ;;  %s31_s23 = sadd.s32 1, %s2220_s30   ;;  %s2226_s29 = sld [smem:[#allocation10_spill]] }
 0x95d   : > { %p28_p12 = scmp.ge.s32.totalorder %s31_s23, 6   ;;  %s2227_s30 = sld [smem:[#allocation11_spill]] }
 0x95e   : > { %s2228_s15 = sld [smem:[#allocation24_spill]]  ;;  %s2229_s16 = sld [smem:[#allocation13_spill]] }
 0x95f   : > { %s2230_s17 = sld [smem:[#allocation14_spill]]  ;;  %s2231_s18 = sld [smem:[#allocation23_spill]] }
 0x960   : > { %s2232_s19 = sld [smem:[#allocation15_spill]]  ;;  %s2233_s20 = sld [smem:[#allocation16_spill]] }
 0x961   : > { %s2234_s21 = sld [smem:[#allocation18_spill]]  ;;  %s2235_s22 = sld [smem:[#allocation20_spill]] }
 0x962   :  { %30 = sbr.rel (!%p28_p12) target bundleno = 16 (0x10), region = 144 }
 0x969   :  { %1196 = vsyncpa [#allocation4], 1 }
 0x96a   :  { %1198 = vsyncpa [#allocation4 + $0x1], 1 }
 0x96b   :  { %1199 = vsyncpa [#allocation6], 1 }
 0x96c   :  { %1201 = vsyncpa [#allocation6 + $0x1], 1 }

</bundles_post_ra>
